<compile_context>
chip_gen: v7x
topology: tpu7x:2x2x1
jax: 0.10.0
libtpu: 0.0.40
codegen_flags: <defaults>
</compile_context>

<pallas_src>
import functools

import numpy as np
import jax
import jax.numpy as jnp
from jax.experimental import pallas as pl
from jax.experimental.pallas import tpu as pltpu


def _round_up(x: int, m: int) -> int:
    return ((x + m - 1) // m) * m


def _tpu_generation() -> int:
    """Best-effort TPU generation from device_kind (default 6 if unknown)."""
    try:
        kind = jax.devices()[0].device_kind.lower()
    except Exception:
        return 6
    for g in (7, 6, 5, 4, 3, 2):
        if f"v{g}" in kind or f"tpu{g}" in kind:
            return g
    return 6


def _pad_mult(dim: int, gen: int) -> int:
    # v6e/v7x MXUs are 256-wide: use 256 padding once the real dim exceeds 128.
    return 256 if (gen >= 6 and dim > 128) else 128


def _mlp_fused_kernel(*refs, num_layers: int, compute_dtype, epilogue_dtype):
    """refs = (x_ref, w0, b0, w1, b1, ..., w_{L-1}, b_{L-1}, o_ref).

    x_ref: (tm, F0_pad)             VMEM, bf16
    w_i:   (Fin_pad_i, Fout_pad_i)  VMEM, compute_dtype (bf16)
    b_i:   (1, Fout_pad_i)          VMEM, epilogue_dtype
    o_ref: (tm, Fout_pad_last)      VMEM, bf16
    """
    x_ref = refs[0]
    o_ref = refs[1 + 2 * num_layers]

    y = x_ref[...]
    for i in range(num_layers):
        w = refs[1 + 2 * i][...]
        b = refs[2 + 2 * i][...]
        # MXU matmul: bf16 operands, f32 accumulation.
        acc = jnp.dot(
            y.astype(compute_dtype), w, preferred_element_type=jnp.float32
        )
        # Bias add (+ ReLU) epilogue in epilogue_dtype (bf16 on v6e/v7x, f32 on v5e).
        y = acc.astype(epilogue_dtype) + b
        if i != num_layers - 1:
            # ReLU; Dropout(p=0.5) is identity in eval mode.
            y = jnp.maximum(y, 0.0)
    o_ref[...] = y.astype(o_ref.dtype)


def mlp_forward_pallas(
    x,
    padded_params,
    out_dim,
    *,
    layer_dims=None,
    compute_dtype=jnp.bfloat16,
    epilogue_dtype=None,
    tm_max=512,
):
    """Run the fused MLP. `padded_params` = [(w_pad, b_pad), ...] with lane-dense shapes."""
    gen = _tpu_generation()
    if epilogue_dtype is None:
        # bf16 bias/ReLU chain on v6e/v7x (bf16 VPU), f32 on v5e and older.
        epilogue_dtype = jnp.bfloat16 if gen >= 6 else jnp.float32

    B, F_in = x.shape
    num_layers = len(padded_params)
    F0_pad = padded_params[0][0].shape[0]
    Fout_last_pad = padded_params[-1][0].shape[1]
    assert F_in <= F0_pad and out_dim <= Fout_last_pad

    in_dtype = compute_dtype   # bf16 activations in  -> half the input DMA bytes
    out_dtype = compute_dtype  # bf16 writeback       -> half the output DMA bytes
    in_isz = np.dtype(in_dtype).itemsize
    out_isz = np.dtype(out_dtype).itemsize
    epi_isz = np.dtype(epilogue_dtype).itemsize

    # ---- Generation-aware VMEM budget & batch-tile (tm) selection ------------------
    weight_bytes = 0
    feat_pads = [F0_pad]
    for (w, _b) in padded_params:
        weight_bytes += w.size * w.dtype.itemsize + w.shape[1] * epi_isz
        feat_pads.append(w.shape[1])
    max_feat = max(feat_pads)

    # v7x has 64 MiB VMEM per TensorCore; v5e/v6e have 128 MiB.
    cap = (44 if gen >= 7 else 96) * 1024 * 1024
    # Conservative: assume the constant-index resident weights may be double-buffered.
    # TODO(synk): set pipeline_mode=pl.Buffered(1) on weight/bias specs once verified
    # supported by the installed JAX, to guarantee single-buffering of resident weights.
    resident = 2 * weight_bytes

    def vmem_need(tm_rows: int) -> int:
        act = 2 * tm_rows * F0_pad * in_isz              # double-buffered input tile
        act += 2 * tm_rows * Fout_last_pad * out_isz     # double-buffered output tile
        act += 2 * tm_rows * max_feat * max(epi_isz, 4)  # live intermediates (conservative)
        return resident + act

    B8 = _round_up(max(B, 8), 8)
    tm = min(B8, tm_max)
    while tm > 8 and vmem_need(tm) > cap:
        tm = _round_up(tm // 2, 8)
    if vmem_need(tm) > cap:
        # TODO(synk): N-tiled (output-feature) fallback path for MLPs whose weight
        # stack does not fit resident in VMEM.
        raise NotImplementedError("MLP weights too large for the all-resident fused kernel")
    # v7x: ensure >=2 grid steps so both TensorCores get work ("parallel" batch axis).
    if gen >= 7 and B8 > 8 and _round_up(B8, tm) // tm < 2:
        tm = max(8, _round_up((B8 + 1) // 2, 8))
    B_pad = _round_up(B8, tm)
    vmem_limit = int(min(cap, max(32 * 1024 * 1024, vmem_need(tm) + 8 * 1024 * 1024)))

    # ---- Input: cast to bf16, pad only the dims that actually need it --------------
    x_in = x.astype(in_dtype)
    if B_pad != B or F0_pad != F_in:
        x_in = jnp.pad(x_in, ((0, B_pad - B), (0, F0_pad - F_in)))

    # ---- Specs / inputs / cost ------------------------------------------------------
    in_specs = [pl.BlockSpec((tm, F0_pad), lambda i: (i, 0))]
    flat_inputs = [x_in]
    flops = 0
    bytes_accessed = x_in.size * x_in.dtype.itemsize
    if layer_dims is None:
        layer_dims = [(w.shape[0], w.shape[1]) for (w, _b) in padded_params]
    for li, (w, b) in enumerate(padded_params):
        fi, fo = w.shape
        # Weights/biases: constant index_map -> DMA'd once, resident across batch tiles.
        in_specs.append(pl.BlockSpec((fi, fo), lambda i: (0, 0)))
        in_specs.append(pl.BlockSpec((1, fo), lambda i: (0, 0)))
        flat_inputs.append(w)
        flat_inputs.append(b.astype(epilogue_dtype).reshape(1, fo))
        rfi, rfo = layer_dims[li]
        flops += 2 * B * rfi * rfo  # real (unpadded) FLOPs
        bytes_accessed += w.size * w.dtype.itemsize + fo * epi_isz
    bytes_accessed += B_pad * Fout_last_pad * out_isz

    kernel = functools.partial(
        _mlp_fused_kernel,
        num_layers=num_layers,
        compute_dtype=compute_dtype,
        epilogue_dtype=epilogue_dtype,
    )

    y_pad = pl.pallas_call(
        kernel,
        out_shape=jax.ShapeDtypeStruct((B_pad, Fout_last_pad), out_dtype),
        grid_spec=pltpu.PrefetchScalarGridSpec(
            num_scalar_prefetch=0,
            grid=(B_pad // tm,),
            in_specs=in_specs,
            out_specs=pl.BlockSpec((tm, Fout_last_pad), lambda i: (i, 0)),
        ),
        compiler_params=pltpu.CompilerParams(
            dimension_semantics=("parallel",),  # batch axis -> both TCs on v7x
            vmem_limit_bytes=vmem_limit,
        ),
        cost_estimate=pl.CostEstimate(
            flops=flops, transcendentals=0, bytes_accessed=bytes_accessed
        ),
    )(*flat_inputs)

    # Slice away batch/feature padding; return f32 like the PyTorch module's logits.
    return y_pad[:B, :out_dim].astype(jnp.float32)


class MLPPallas:
    """Mirror of the PyTorch MLP: hidden layers (Linear+ReLU+Dropout) + final plain Linear."""

    def __init__(self, input_dim, output_dim, hidden, key, compute_dtype=jnp.bfloat16):
        dims = [input_dim] + list(hidden) + [output_dim]
        self.layers_num = len(dims) - 1
        self.output_dim = output_dim
        self.compute_dtype = compute_dtype
        self.gen = _tpu_generation()
        self.params = []         # f32, true shapes, stored (in, out) = PyTorch weight.T
        self.padded_params = []  # lane-dense padded: weights in compute_dtype, biases f32
        self.layer_dims = []
        for i in range(self.layers_num):
            fan_in, fan_out = dims[i], dims[i + 1]
            self.layer_dims.append((fan_in, fan_out))
            key, kw, kb = jax.random.split(key, 3)
            bound = 1.0 / float(fan_in) ** 0.5
            w = jax.random.uniform(
                kw, (fan_in, fan_out), jnp.float32, minval=-bound, maxval=bound
            )
            b = jax.random.uniform(
                kb, (fan_out,), jnp.float32, minval=-bound, maxval=bound
            )
            self.params.append((w, b))

            fin_p = _round_up(fan_in, _pad_mult(fan_in, self.gen))
            fout_p = _round_up(fan_out, _pad_mult(fan_out, self.gen))
            w_pad = (
                jnp.zeros((fin_p, fout_p), compute_dtype)
                .at[:fan_in, :fan_out]
                .set(w.astype(compute_dtype))
            )
            b_pad = jnp.zeros((fout_p,), jnp.float32).at[:fan_out].set(b)
            self.padded_params.append((w_pad, b_pad))

    def __call__(self, x):
        return mlp_forward_pallas(
            x,
            self.padded_params,
            self.output_dim,
            layer_dims=self.layer_dims,
            compute_dtype=self.compute_dtype,
        )


if __name__ == "__main__":
    key = jax.random.PRNGKey(0)
    key, kx, kp = jax.random.split(key, 3)

    batch = 8
    input_dim = 16
    hidden = [32, 32]
    output_dim = 4

    x = jax.random.normal(kx, (batch, input_dim), dtype=jnp.float32)

    model = MLPPallas(input_dim, output_dim, hidden, kp)
    y = jax.block_until_ready(model(x))
    assert y.shape == (batch, output_dim)

    # Reference mirrors the kernel numerics: bf16 operands, f32 accumulation,
    # generation-dependent epilogue dtype, bf16 output cast back to f32.
    gen = _tpu_generation()
    epi = jnp.bfloat16 if gen >= 6 else jnp.float32
    ref = x.astype(jnp.bfloat16)
    for i, (w, b) in enumerate(model.params):
        acc = jnp.dot(
            ref.astype(jnp.bfloat16),
            w.astype(jnp.bfloat16),
            preferred_element_type=jnp.float32,
        )
        ref = acc.astype(epi) + b.astype(epi)
        if i != model.layers_num - 1:
            ref = jnp.maximum(ref, 0.0)
    ref = ref.astype(jnp.bfloat16).astype(jnp.float32)

    assert jnp.allclose(y, ref, atol=1e-2, rtol=1e-2), "mismatch vs reference"

    print("KERNEL_OK")
</pallas_src>

<mosaic_0001>
module attributes {stable_mosaic.version = 11 : i64} {
  func.func @_mlp_fused_kernel(%arg0: i32, %arg1: memref<8x128xbf16, #tpu.memory_space<vmem>>, %arg2: memref<128x128xbf16, #tpu.memory_space<vmem>>, %arg3: memref<1x128xbf16, #tpu.memory_space<vmem>>, %arg4: memref<128x128xbf16, #tpu.memory_space<vmem>>, %arg5: memref<1x128xbf16, #tpu.memory_space<vmem>>, %arg6: memref<128x128xbf16, #tpu.memory_space<vmem>>, %arg7: memref<1x128xbf16, #tpu.memory_space<vmem>>, %arg8: memref<8x128xbf16, #tpu.memory_space<vmem>>) attributes {dimension_semantics = [#tpu.dimension_semantics<parallel>], iteration_bounds = array<i64: 1>, scalar_prefetch = 0 : i64, scratch_operands = 0 : i64, tpu.core_type = #tpu.core_type<tc>, window_params = [{transform_indices = @transform_0, window_bounds = array<i64: 8, 128>}, {pipeline_mode = #tpu.pipeline_mode<synchronous>, transform_indices = @transform_1, window_bounds = array<i64: 128, 128>}, {pipeline_mode = #tpu.pipeline_mode<synchronous>, transform_indices = @transform_2, window_bounds = array<i64: 1, 128>}, {pipeline_mode = #tpu.pipeline_mode<synchronous>, transform_indices = @transform_3, window_bounds = array<i64: 128, 128>}, {pipeline_mode = #tpu.pipeline_mode<synchronous>, transform_indices = @transform_4, window_bounds = array<i64: 1, 128>}, {pipeline_mode = #tpu.pipeline_mode<synchronous>, transform_indices = @transform_5, window_bounds = array<i64: 128, 128>}, {pipeline_mode = #tpu.pipeline_mode<synchronous>, transform_indices = @transform_6, window_bounds = array<i64: 1, 128>}, {transform_indices = @transform_7, window_bounds = array<i64: 8, 128>}]} {
    %c0 = arith.constant 0 : index
    %c0_0 = arith.constant 0 : index
    %0 = vector.load %arg1[%c0, %c0_0] : memref<8x128xbf16, #tpu.memory_space<vmem>>, vector<8x128xbf16>
    %c0_1 = arith.constant 0 : index
    %c0_2 = arith.constant 0 : index
    %1 = vector.load %arg2[%c0_1, %c0_2] : memref<128x128xbf16, #tpu.memory_space<vmem>>, vector<128x128xbf16>
    %c0_3 = arith.constant 0 : index
    %c0_4 = arith.constant 0 : index
    %2 = vector.load %arg3[%c0_3, %c0_4] : memref<1x128xbf16, #tpu.memory_space<vmem>>, vector<1x128xbf16>
    %cst = arith.constant dense<0.000000e+00> : vector<8x128xf32>
    %3 = tpu.matmul %0, %1, %cst {dimension_numbers = #tpu.dot_dimension_numbers<[1], [0], [0], [1], [0, 0, 1, 1], [], []>} : vector<8x128xbf16>, vector<128x128xbf16>, vector<8x128xf32> -> vector<8x128xf32>
    %4 = arith.truncf %3 : vector<8x128xf32> to vector<8x128xbf16>
    %5 = vector.broadcast %2 : vector<1x128xbf16> to vector<8x128xbf16>
    %6 = arith.addf %4, %5 : vector<8x128xbf16>
    %cst_5 = arith.constant 0.000000e+00 : bf16
    %7 = vector.broadcast %cst_5 : bf16 to vector<8x128xbf16>
    %8 = arith.maximumf %6, %7 : vector<8x128xbf16>
    %c0_6 = arith.constant 0 : index
    %c0_7 = arith.constant 0 : index
    %9 = vector.load %arg4[%c0_6, %c0_7] : memref<128x128xbf16, #tpu.memory_space<vmem>>, vector<128x128xbf16>
    %c0_8 = arith.constant 0 : index
    %c0_9 = arith.constant 0 : index
    %10 = vector.load %arg5[%c0_8, %c0_9] : memref<1x128xbf16, #tpu.memory_space<vmem>>, vector<1x128xbf16>
    %cst_10 = arith.constant dense<0.000000e+00> : vector<8x128xf32>
    %11 = tpu.matmul %8, %9, %cst_10 {dimension_numbers = #tpu.dot_dimension_numbers<[1], [0], [0], [1], [0, 0, 1, 1], [], []>} : vector<8x128xbf16>, vector<128x128xbf16>, vector<8x128xf32> -> vector<8x128xf32>
    %12 = arith.truncf %11 : vector<8x128xf32> to vector<8x128xbf16>
    %13 = vector.broadcast %10 : vector<1x128xbf16> to vector<8x128xbf16>
    %14 = arith.addf %12, %13 : vector<8x128xbf16>
    %cst_11 = arith.constant 0.000000e+00 : bf16
    %15 = vector.broadcast %cst_11 : bf16 to vector<8x128xbf16>
    %16 = arith.maximumf %14, %15 : vector<8x128xbf16>
    %c0_12 = arith.constant 0 : index
    %c0_13 = arith.constant 0 : index
    %17 = vector.load %arg6[%c0_12, %c0_13] : memref<128x128xbf16, #tpu.memory_space<vmem>>, vector<128x128xbf16>
    %c0_14 = arith.constant 0 : index
    %c0_15 = arith.constant 0 : index
    %18 = vector.load %arg7[%c0_14, %c0_15] : memref<1x128xbf16, #tpu.memory_space<vmem>>, vector<1x128xbf16>
    %cst_16 = arith.constant dense<0.000000e+00> : vector<8x128xf32>
    %19 = tpu.matmul %16, %17, %cst_16 {dimension_numbers = #tpu.dot_dimension_numbers<[1], [0], [0], [1], [0, 0, 1, 1], [], []>} : vector<8x128xbf16>, vector<128x128xbf16>, vector<8x128xf32> -> vector<8x128xf32>
    %20 = arith.truncf %19 : vector<8x128xf32> to vector<8x128xbf16>
    %21 = vector.broadcast %18 : vector<1x128xbf16> to vector<8x128xbf16>
    %22 = arith.addf %20, %21 : vector<8x128xbf16>
    %c0_17 = arith.constant 0 : index
    %c0_18 = arith.constant 0 : index
    %23 = vector.load %arg8[%c0_17, %c0_18] : memref<8x128xbf16, #tpu.memory_space<vmem>>, vector<8x128xbf16>
    tpu.vector_store %arg8[%c0_17, %c0_18], %22 {strides = array<i32>} : memref<8x128xbf16, #tpu.memory_space<vmem>>, vector<8x128xbf16>,
    return
  }
  func.func @transform_0(%arg0: i32) -> (i32, i32) {
    %c0_i32 = arith.constant 0 : i32
    %c0_i32_0 = arith.constant 0 : i32
    return %arg0, %c0_i32 : i32, i32
  }
  func.func @transform_1(%arg0: i32) -> (i32, i32) {
    %c0_i32 = arith.constant 0 : i32
    %c0_i32_0 = arith.constant 0 : i32
    %c0_i32_1 = arith.constant 0 : i32
    return %c0_i32, %c0_i32_0 : i32, i32
  }
  func.func @transform_2(%arg0: i32) -> (i32, i32) {
    %c0_i32 = arith.constant 0 : i32
    %c0_i32_0 = arith.constant 0 : i32
    %c0_i32_1 = arith.constant 0 : i32
    return %c0_i32, %c0_i32_0 : i32, i32
  }
  func.func @transform_3(%arg0: i32) -> (i32, i32) {
    %c0_i32 = arith.constant 0 : i32
    %c0_i32_0 = arith.constant 0 : i32
    %c0_i32_1 = arith.constant 0 : i32
    return %c0_i32, %c0_i32_0 : i32, i32
  }
  func.func @transform_4(%arg0: i32) -> (i32, i32) {
    %c0_i32 = arith.constant 0 : i32
    %c0_i32_0 = arith.constant 0 : i32
    %c0_i32_1 = arith.constant 0 : i32
    return %c0_i32, %c0_i32_0 : i32, i32
  }
  func.func @transform_5(%arg0: i32) -> (i32, i32) {
    %c0_i32 = arith.constant 0 : i32
    %c0_i32_0 = arith.constant 0 : i32
    %c0_i32_1 = arith.constant 0 : i32
    return %c0_i32, %c0_i32_0 : i32, i32
  }
  func.func @transform_6(%arg0: i32) -> (i32, i32) {
    %c0_i32 = arith.constant 0 : i32
    %c0_i32_0 = arith.constant 0 : i32
    %c0_i32_1 = arith.constant 0 : i32
    return %c0_i32, %c0_i32_0 : i32, i32
  }
  func.func @transform_7(%arg0: i32) -> (i32, i32) {
    %c0_i32 = arith.constant 0 : i32
    %c0_i32_0 = arith.constant 0 : i32
    return %arg0, %c0_i32 : i32, i32
  }
}

</mosaic_0001>

<bundles_post_ra>
// kernel: tpu_custom_call.1
= control target key start
LH: loop header
LB: loop body
LE: loop exit
PB: predicated region body
PF: predicated region fallthrough
CT: control target
= control target key end

     0   :  { %12 = vsyncpa [#allocation3], 0  ;;  %s865_s0 = inlined_call_operand.hbm [shape: bf16[8,128], index: 0, kind: input, shape index: {}]   ;;  %s866_s1 = inlined_call_operand.hbm [shape: bf16[128,128], index: 1, kind: input, shape index: {}]   ;;  %s867_s2 = inlined_call_operand.vmem [shape: bf16[1,128], index: 2, kind: input, shape index: {}]   ;;  %s868_s3 = inlined_call_operand.hbm [shape: bf16[128,128], index: 3, kind: input, shape index: {}]   ;;  %s869_s4 = inlined_call_operand.vmem [shape: bf16[1,128], index: 4, kind: input, shape index: {}]   ;;  %s870_s5 = inlined_call_operand.hbm [shape: bf16[128,128], index: 5, kind: input, shape index: {}]   ;;  %s871_s6 = inlined_call_operand.vmem [shape: bf16[1,128], index: 6, kind: input, shape index: {}]   ;;  %s872_s7 = inlined_call_operand.hbm [shape: bf16[8,128], index: 7, kind: output, shape index: {}]  }
   0x1   :  { %13 = vsyncpa [#allocation6], 0 }
   0x2   :  { %14 = vsyncpa [#allocation9], 0 }
   0x3   :  { %15 = vsyncpa [#allocation4], 0  ;;  %s707_s24 = smov [#allocation5]   ;;  %s589_s28 = scalar_lea.hbm %s866_s1, 1024 }
   0x4   :  { %s31_s25 = sshll.u32 %s707_s24, 4  ;;  %p590_p0 = scmp.ne.s32.totalorder %s866_s1, %s589_s28  ;;  %s32_s25 = int_to_ptr.vmem [resolvable:$true] %s31_s25 }
   0x5   :  { %p593_p1 = scmp.lt.u32.totalorder %s589_s28, %s866_s1 }
   0x7   :  { %p595_p2 = pnand %p593_p1, %p590_p0 }
   0x9   :  { %598 = shalt.err (!%p595_p2)
}
   0xa   :  { %s599_s10 = scalar_lea.vmem %s32_s25, 1024  ;;  %p604_p4 = scmp.lt.s32.totalorder %s32_s25, %s32_s25 }
   0xb   :  { %p600_p3 = scmp.ne.s32.totalorder %s32_s25, %s599_s10  ;;  %p605_p5 = scmp.lt.s32.totalorder %s599_s10, %s599_s10 }
   0xd   :  { %p606_p6 = por %p605_p5, %p604_p4 }
   0xf   :  { %p607_p7 = pnand %p606_p6, %p600_p3 }
  0x11   :  { %610 = shalt.err (!%p607_p7)
}
  0x12   :  { %s708_s11 = smov 64   ;;  %s709_s12 = smov 4  }
  0x13   :  { %37 = dma.hbm_to_vmem [thread:$0]  %s866_s1, 1024, %s32_s25, [#allocation6], %s708_s11, %s708_s11, %s709_s12  }
  0x14   :  { %s710_s15 = smov [#allocation2]   ;;  %s711_s17 = smov [#allocation7]  }
  0x15   :  { %s22_s16 = sshll.u32 %s710_s15, 4  ;;  %s45_s18 = sshll.u32 %s711_s17, 4  ;;  %s23_s16 = int_to_ptr.vmem [resolvable:$true] %s22_s16  ;;  %s46_s18 = int_to_ptr.vmem [resolvable:$true] %s45_s18 }
  0x16   :  { %s611_s21 = scalar_lea.hbm %s865_s0, 64 }
  0x17   :  { %p612_p8 = scmp.ne.s32.totalorder %s865_s0, %s611_s21  ;;  %p615_p9 = scmp.lt.u32.totalorder %s611_s21, %s865_s0 }
  0x19   :  { %p617_p10 = pnand %p615_p9, %p612_p8 }
  0x1b   :  { %620 = shalt.err (!%p617_p10)
}
  0x1c   :  { %s621_s1 = scalar_lea.vmem %s23_s16, 64  ;;  %p626_p12 = scmp.lt.s32.totalorder %s23_s16, %s23_s16 }
  0x1d   :  { %p622_p11 = scmp.ne.s32.totalorder %s23_s16, %s621_s1  ;;  %p627_p13 = scmp.lt.s32.totalorder %s621_s1, %s621_s1 }
  0x1f   :  { %p628_p0 = por %p627_p13, %p626_p12 }
  0x21   :  { %p629_p1 = pnand %p628_p0, %p622_p11 }
  0x23   :  { %632 = shalt.err (!%p629_p1)
}
  0x24   :  { %25 = dma.hbm_to_vmem [thread:$0]  %s865_s0, 64, %s23_s16, [#allocation3]  }
  0x25   :  { %s633_s30 = scalar_lea.hbm %s868_s3, 1024 }
  0x26   :  { %p634_p2 = scmp.ne.s32.totalorder %s868_s3, %s633_s30  ;;  %p637_p3 = scmp.lt.u32.totalorder %s633_s30, %s868_s3 }
  0x28   :  { %p639_p4 = pnand %p637_p3, %p634_p2 }
  0x2a   :  { %642 = shalt.err (!%p639_p4)
}
  0x2b   :  { %s643_s14 = scalar_lea.vmem %s46_s18, 1024  ;;  %p648_p6 = scmp.lt.s32.totalorder %s46_s18, %s46_s18 }
  0x2c   :  { %p644_p5 = scmp.ne.s32.totalorder %s46_s18, %s643_s14  ;;  %p649_p7 = scmp.lt.s32.totalorder %s643_s14, %s643_s14 }
  0x2e   :  { %p650_p8 = por %p649_p7, %p648_p6 }
  0x30   :  { %p651_p9 = pnand %p650_p8, %p644_p5 }
  0x32   :  { %654 = shalt.err (!%p651_p9)
}
  0x33   :  { %51 = dma.hbm_to_vmem [thread:$0]  %s868_s3, 1024, %s46_s18, [#allocation6], %s708_s11, %s708_s11, %s709_s12  }
  0x34   :  { %s712_s16 = smov [#allocation8]   ;;  %s655_s21 = scalar_lea.hbm %s870_s5, 1024 }
  0x35   :  { %s59_s17 = sshll.u32 %s712_s16, 4  ;;  %p656_p10 = scmp.ne.s32.totalorder %s870_s5, %s655_s21  ;;  %s60_s17 = int_to_ptr.vmem [resolvable:$true] %s59_s17 }
  0x36   :  { %p659_p11 = scmp.lt.u32.totalorder %s655_s21, %s870_s5 }
  0x38   :  { %p661_p12 = pnand %p659_p11, %p656_p10 }
  0x3a   :  { %664 = shalt.err (!%p661_p12)
}
  0x3b   :  { %s665_s1 = scalar_lea.vmem %s60_s17, 1024  ;;  %p670_p0 = scmp.lt.s32.totalorder %s60_s17, %s60_s17 }
  0x3c   :  { %p666_p13 = scmp.ne.s32.totalorder %s60_s17, %s665_s1  ;;  %p671_p1 = scmp.lt.s32.totalorder %s665_s1, %s665_s1 }
  0x3e   :  { %p672_p2 = por %p671_p1, %p670_p0 }
  0x40   :  { %p673_p3 = pnand %p672_p2, %p666_p13 }
  0x42   :  { %676 = shalt.err (!%p673_p3)
}
  0x43   :  { %65 = dma.hbm_to_vmem [thread:$0]  %s870_s5, 1024, %s60_s17, [#allocation9], %s708_s11, %s708_s11, %s709_s12  }
  0x44   :  { %699 = dma.done.wait [#allocation3], 64  }
  0x45   :  { %700 = vsyncadd [#allocation3], 4294967232 }
  0x46   :  { %701 = dma.done.wait [#allocation6], 2048  }
  0x47   :  { %702 = vsyncadd [#allocation6], 4294965248 }
  0x48   :  { %703 = dma.done.wait [#allocation9], 1024  }
  0x49   :  { %704 = vsyncadd [#allocation9], 4294966272  ;;  %v713_v0 = vmov 0.0   ;;  %vm714_vm0 = vmmov 0   ;;  %v565_v1 = vld [vmem:[#allocation5] sm:$0xff]   ;;  %v566_v2 = vld [vmem:[#allocation5 + $0x8] sm:$0xff]   ;;  %v191_v24 = vlaneseq }
  0x4a   :  { %495 = vmatprep.subr.bf16.mxu0 %v713_v0  ;;  %511 = vmatprep.mubr.msk.bf16.mxu0 %vm714_vm0, %v713_v0  ;;  %v567_v3 = vld [vmem:[#allocation5 + $0x10] sm:$0xff]   ;;  %v573_v4 = vld [vmem:[#allocation7] sm:$0xff]   ;;  %v568_v5 = vld [vmem:[#allocation5 + $0x18] sm:$0xff]   ;;  %v715_v36 = vmov 0   ;;  %s716_s28 = smov [#allocation10]  }
  0x4b   :  { %515 = vmatprep.subr.bf16.mxu1 %v713_v0  ;;  %531 = vmatprep.mubr.msk.bf16.mxu1 %vm714_vm0, %v713_v0  ;;  %v574_v6 = vld [vmem:[#allocation7 + $0x8] sm:$0xff]   ;;  %v569_v7 = vld [vmem:[#allocation5 + $0x20] sm:$0xff]   ;;  %v575_v8 = vld [vmem:[#allocation7 + $0x10] sm:$0xff]   ;;  %v192_v25 = vshrl.u32 %v191_v24, 7  ;;  %s433_s29 = sshll.u32 %s716_s28, 4  ;;  %s434_s29 = int_to_ptr.vmem [resolvable:$true] %s433_s29 }
  0x4c   :  { %496 = vmatpush3.bf16.msra.mxu0 %v565_v1  ;;  %516 = vmatpush3.bf16.msra.mxu1 %v573_v4  ;;  %v570_v9 = vld [vmem:[#allocation5 + $0x28] sm:$0xff]   ;;  %v576_v10 = vld [vmem:[#allocation7 + $0x18] sm:$0xff]   ;;  %v571_v11 = vld [vmem:[#allocation5 + $0x30] sm:$0xff]   ;;  %p682_p5 = scmp.lt.s32.totalorder %s434_s29, %s434_s29 }
  0x4d   :  { %497 = vmatprep.subr.bf16.mxu0 %v713_v0  ;;  %517 = vmatprep.subr.bf16.mxu1 %v713_v0  ;;  %v577_v12 = vld [vmem:[#allocation7 + $0x20] sm:$0xff]   ;;  %v572_v13 = vld [vmem:[#allocation5 + $0x38] sm:$0xff]   ;;  %v578_v14 = vld [vmem:[#allocation7 + $0x28] sm:$0xff]   ;;  %v193_v28 = vsub.s32 0, %v192_v25 }
  0x4e   :  { %v81_v15 = vld [vmem:[#allocation2] sm:$0xf]  ;;  %v579_v16 = vld [vmem:[#allocation7 + $0x30] sm:$0xff]   ;;  %v581_v18 = vld [vmem:[#allocation8] sm:$0xff]  }
  0x4f   :  { %v580_v17 = vld [vmem:[#allocation7 + $0x38] sm:$0xff]   ;;  %v582_v19 = vld [vmem:[#allocation8 + $0x8] sm:$0xff]   ;;  %v583_v20 = vld [vmem:[#allocation8 + $0x10] sm:$0xff]  }
  0x50   :  { %498 = vmatpush3.bf16.msra.mxu0 %v566_v2  ;;  %518 = vmatpush3.bf16.msra.mxu1 %v574_v6  ;;  %v584_v21 = vld [vmem:[#allocation8 + $0x18] sm:$0xff]   ;;  %v585_v22 = vld [vmem:[#allocation8 + $0x20] sm:$0xff]   ;;  %v586_v23 = vld [vmem:[#allocation8 + $0x28] sm:$0xff]  }
  0x51   :  { %499 = vmatprep.subr.bf16.mxu0 %v713_v0  ;;  %519 = vmatprep.subr.bf16.mxu1 %v713_v0  ;;  %v98_v26 = vld [vmem:[%s867_s2] sm:$0x1]  ;;  %v587_v38 = vld [vmem:[#allocation8 + $0x30] sm:$0xff]  }
  0x52   :  { %v189_v27 = vpack.i.b16 %v98_v26, %v98_v26  ;;  %v588_v39 = vld [vmem:[#allocation8 + $0x38] sm:$0xff]  }
  0x53   :  { %v213_v40 = vld [vmem:[%s869_s4] sm:$0x1]  ;;  %s677_s4 = scalar_lea.vmem %s434_s29, 64 }
  0x54   :  { %500 = vmatpush3.bf16.msra.mxu0 %v567_v3  ;;  %520 = vmatpush3.bf16.msra.mxu1 %v575_v8  ;;  %v194_v29 = vrot.slane %v189_v27, %v193_v28  ;;  %v304_v41 = vpack.i.b16 %v213_v40, %v213_v40  ;;  %v328_v50 = vld [vmem:[%s871_s6] sm:$0x1]  ;;  %p678_p4 = scmp.ne.s32.totalorder %s434_s29, %s677_s4  ;;  %p683_p6 = scmp.lt.s32.totalorder %s677_s4, %s677_s4 }
  0x55   :  { %501 = vmatprep.subr.bf16.mxu0 %v713_v0  ;;  %521 = vmatprep.subr.bf16.mxu1 %v713_v0  ;;  %v419_v51 = vpack.i.b16 %v328_v50, %v328_v50 }
  0x56   :  { %v309_v42 = vrot.slane %v304_v41, %v193_v28  ;;  %p684_p7 = por %p683_p6, %p682_p5 }
  0x57   :  { %v424_v52 = vrot.slane %v419_v51, %v193_v28 }
  0x58   :  { %502 = vmatpush3.bf16.msra.mxu0 %v568_v5  ;;  %522 = vmatpush3.bf16.msra.mxu1 %v576_v10  ;;  %p685_p8 = pnand %p684_p7, %p678_p4 }
  0x59   :  { %503 = vmatprep.subr.bf16.mxu0 %v713_v0  ;;  %523 = vmatprep.subr.bf16.mxu1 %v713_v0 }
  0x5c   :  { %504 = vmatpush3.bf16.msra.mxu0 %v569_v7  ;;  %524 = vmatpush3.bf16.msra.mxu1 %v577_v12 }
  0x5d   :  { %505 = vmatprep.subr.bf16.mxu0 %v713_v0  ;;  %525 = vmatprep.subr.bf16.mxu1 %v713_v0 }
  0x60   :  { %506 = vmatpush3.bf16.msra.mxu0 %v570_v9  ;;  %526 = vmatpush3.bf16.msra.mxu1 %v578_v14 }
  0x61   :  { %507 = vmatprep.subr.bf16.mxu0 %v713_v0  ;;  %527 = vmatprep.subr.bf16.mxu1 %v713_v0 }
  0x64   :  { %508 = vmatpush3.bf16.msra.mxu0 %v571_v11  ;;  %528 = vmatpush3.bf16.msra.mxu1 %v579_v16 }
  0x65   :  { %509 = vmatprep.subr.bf16.mxu0 %v713_v0  ;;  %529 = vmatprep.subr.bf16.mxu1 %v713_v0 }
  0x68   :  { %510 = vmatpush3.bf16.msra.mxu0 %v572_v13  ;;  %530 = vmatpush3.bf16.msra.mxu1 %v580_v17 }
  0x69   :  { %535 = vmatprep.subr.bf16.mxu0 %v713_v0 }
  0x6b   :  { %512 = vmatmul.mubr.bf16.vlgmr.msra.gmra.mrb[0].mxu0 %v81_v15 }
  0x6c   :  { %551 = vmatprep.mubr.msk.bf16.mxu0 %vm714_vm0, %v713_v0  ;;  %536 = vmatpush3.bf16.msra.mxu0 %v581_v18 }
  0x6d   :  { %537 = vmatprep.subr.bf16.mxu0 %v713_v0 }
  0x70   :  { %538 = vmatpush3.bf16.msra.mxu0 %v582_v19 }
  0x71   :  { %539 = vmatprep.subr.bf16.mxu0 %v713_v0 }
  0x74   :  { %540 = vmatpush3.bf16.msra.mxu0 %v583_v20 }
  0x75   :  { %541 = vmatprep.subr.bf16.mxu0 %v713_v0 }
  0x78   :  { %542 = vmatpush3.bf16.msra.mxu0 %v584_v21 }
  0x79   :  { %543 = vmatprep.subr.bf16.mxu0 %v713_v0 }
  0x7c   :  { %544 = vmatpush3.bf16.msra.mxu0 %v585_v22 }
  0x7d   :  { %545 = vmatprep.subr.bf16.mxu0 %v713_v0 }
  0x80   :  { %546 = vmatpush3.bf16.msra.mxu0 %v586_v23 }
  0x81   :  { %547 = vmatprep.subr.bf16.mxu0 %v713_v0 }
  0x84   :  { %548 = vmatpush3.bf16.msra.mxu0 %v587_v38 }
  0x85   :  { %549 = vmatprep.subr.bf16.mxu0 %v713_v0 }
  0x88   :  { %550 = vmatpush3.bf16.msra.mxu0 %v588_v39 }
 0x13e   :  { %v181_v30 = vpop.f32.mrb[0].mxu0 }
 0x13f   :  { %v187_v31 = vpack.c.bf16 %v181_v30, %v181_v30  ;;  %v513_v32 = vpop.f32.mrb[1].mxu0 }
 0x140   :  { %v184_v33 = vpop.f32.mrb[2].mxu0 }
 0x141   :  { %v195_v34 = vadd.bf16 %v194_v29, %v187_v31  ;;  %v514_v35 = vpop.f32.mrb[3].mxu0 }
 0x143   :  { %v196_v37 = vmax.bf16 %v715_v36, %v195_v34 }
 0x145   :  { %532 = vmatmul.mubr.bf16.vlgmr.msra.gmra.mrb[0].mxu1 %v196_v37 }
 0x218   :  { %v296_v43 = vpop.f32.mrb[0].mxu1 }
 0x219   :  { %v302_v44 = vpack.c.bf16 %v296_v43, %v296_v43  ;;  %v533_v45 = vpop.f32.mrb[1].mxu1 }
 0x21a   :  { %v299_v46 = vpop.f32.mrb[2].mxu1 }
 0x21b   :  { %v310_v47 = vadd.bf16 %v309_v42, %v302_v44  ;;  %v534_v48 = vpop.f32.mrb[3].mxu1 }
 0x21d   :  { %v311_v49 = vmax.bf16 %v715_v36, %v310_v47 }
 0x21f   :  { %552 = vmatmul.mubr.bf16.vlgmr.msra.gmra.mrb[4].mxu0 %v311_v49 }
 0x2f2   :  { %v411_v53 = vpop.f32.mrb[4].mxu0 }
 0x2f3   :  { %v417_v54 = vpack.c.bf16 %v411_v53, %v411_v53  ;;  %v553_v55 = vpop.f32.mrb[5].mxu0 }
 0x2f4   :  { %v414_v56 = vpop.f32.mrb[6].mxu0 }
 0x2f5   :  { %v425_v57 = vadd.bf16 %v424_v52, %v417_v54  ;;  %v554_v58 = vpop.f32.mrb[7].mxu0 }
 0x2f7   :  { %426 = vst [vmem:[#allocation10] sm:$0xf] %v425_v57 }
 0x2f8   :  { %688 = shalt.err (!%p685_p8)
}
 0x2f9   :  { %s689_s8 = scalar_lea.hbm %s872_s7, 64 }
 0x2fa   :  { %p690_p9 = scmp.ne.s32.totalorder %s872_s7, %s689_s8  ;;  %p693_p10 = scmp.lt.u32.totalorder %s689_s8, %s872_s7 }
 0x2fc   :  { %p695_p11 = pnand %p693_p10, %p690_p9 }
 0x2fe   :  { %698 = shalt.err (!%p695_p11)
}
 0x2ff   :  { %436 = dma.vmem_to_hbm [thread:$0]  %s434_s29, 64, %s872_s7, [#allocation4]  }
 0x300   :  { %705 = dma.done.wait [#allocation4], 64  }
 0x301   :  { %706 = vsyncadd [#allocation4], 4294967232 }
 0x302   :  { %440 = vsyncpa [#allocation3], 1 }
 0x303   :  { %441 = vsyncpa [#allocation6], 1 }
 0x304   :  { %442 = vsyncpa [#allocation9], 1 }
 0x305   :  { %443 = vsyncpa [#allocation4], 1 }

</bundles_post_ra>
